<compile_context>
chip_gen: v6e
topology: v6e:2x2x1
jax: 0.10.0
libtpu: 0.0.40
codegen_flags: <defaults>
</compile_context>

<pallas_src>
import functools

import jax
import jax.numpy as jnp
from jax.experimental import pallas as pl
from jax.experimental.pallas import tpu as pltpu

_SQRT_2_OVER_PI = 0.7978845608028654


def _gelu(x):
    # BERT-pytorch GELU (tanh approximation).
    return 0.5 * x * (1.0 + jnp.tanh(_SQRT_2_OVER_PI * (x + 0.044715 * x * x * x)))


def _layernorm(x, gamma, beta, eps=1e-6):
    # BERT-pytorch LayerNorm: a2 * (x - mean) / (std + eps) + b2 with unbiased std (ddof=1).
    h = x.shape[-1]
    mean = jnp.mean(x, axis=-1, keepdims=True)
    d = x - mean
    var = jnp.sum(d * d, axis=-1, keepdims=True) * (1.0 / (h - 1))
    inv = pl.reciprocal(jnp.sqrt(var) + eps, approx=True)   # EUP slot, not VPU divide
    return gamma * (d * inv) + beta


def _transformer_block_kernel(
    xq_ref, xkv_ref, maskb_ref,
    wq_ref, bq_ref, wk_ref, bk_ref, wv_ref, bv_ref, wo_ref, bo_ref,
    w1_ref, b1_ref, w2_ref, b2_ref, ln_g_ref, ln_b_ref,
    *out_and_scratch,
    dk, matmul_dtype, return_attn,
):
    if return_attn:
        out_ref, attn_ref, acc_ref = out_and_scratch
    else:
        out_ref, acc_ref = out_and_scratch
        attn_ref = None

    h_id = pl.program_id(2)
    n_heads = pl.num_programs(2)

    @pl.when(h_id == 0)
    def _():
        acc_ref[...] = jnp.zeros_like(acc_ref)

    xq = xq_ref[0]                                   # (TQ, H) f32 query rows
    xq_mm = xq.astype(matmul_dtype)
    xkv_mm = xkv_ref[0].astype(matmul_dtype)         # (S, H)  full keys/values rows

    # Per-head projections. Weight slices arrive head-major from the BlockSpec, so
    # there is no in-kernel head slicing or concatenation.
    q = jnp.dot(xq_mm, wq_ref[0], preferred_element_type=jnp.float32) + bq_ref[0]   # (TQ, dk)
    k = jnp.dot(xkv_mm, wk_ref[0], preferred_element_type=jnp.float32) + bk_ref[0]  # (S, dk)
    v = jnp.dot(xkv_mm, wv_ref[0], preferred_element_type=jnp.float32) + bv_ref[0]  # (S, dk)

    # scores = q @ k.T without materializing a transpose (contract last dims).
    scores = jax.lax.dot_general(
        q.astype(matmul_dtype), k.astype(matmul_dtype),
        dimension_numbers=(((1,), (1,)), ((), ())),
        preferred_element_type=jnp.float32)          # (TQ, S)
    scale = 1.0 / (dk ** 0.5)
    scores = scores * scale + maskb_ref[0]           # additive mask: 0 or -1e9

    # Softmax over keys (finite even for fully-masked rows thanks to max subtraction).
    scores = scores - jnp.max(scores, axis=-1, keepdims=True)
    e = jnp.exp(scores)
    denom = jnp.sum(e, axis=-1, keepdims=True)
    p = e * pl.reciprocal(denom, approx=True)

    if return_attn:
        attn_ref[0, 0, :, :] = p.astype(attn_ref.dtype)

    ctx = jnp.dot(p.astype(matmul_dtype), v.astype(matmul_dtype),
                  preferred_element_type=jnp.float32)            # (TQ, dk)

    # concat_h(ctx_h) @ Wo == sum_h ctx_h @ Wo[h*dk:(h+1)*dk, :]  -> accumulate.
    acc_ref[...] += jnp.dot(ctx.astype(matmul_dtype), wo_ref[0],
                            preferred_element_type=jnp.float32)  # (TQ, H)

    @pl.when(h_id == n_heads - 1)
    def _():
        gamma = ln_g_ref[...]
        beta = ln_b_ref[...]

        att_out = acc_ref[...] + bo_ref[...]
        sub1 = xq + _layernorm(att_out, gamma, beta)             # x + norm(attn(x))

        h1 = _gelu(jnp.dot(sub1.astype(matmul_dtype), w1_ref[...],
                           preferred_element_type=jnp.float32) + b1_ref[...])
        ffn = jnp.dot(h1.astype(matmul_dtype), w2_ref[...],
                      preferred_element_type=jnp.float32) + b2_ref[...]

        out_ref[0] = _layernorm(sub1 + ffn, gamma, beta).astype(out_ref.dtype)


def transformer_block(x, mask, params, *, heads, q_tile=128,
                      matmul_dtype=jnp.bfloat16, return_attn=True,
                      attn_dtype=jnp.float32):
    B, S, H = x.shape
    d_ff = params["w1"].shape[1]
    assert H % heads == 0
    dk = H // heads

    tq = min(q_tile, S)
    assert S % tq == 0
    n_qt = S // tq

    f32 = jnp.float32
    mm = matmul_dtype

    # Head-major weight layout, done once on the host (free); matmul weights in bf16
    # for the MXU, biases / LN params stay f32 for the VPU epilogue.
    wq3 = params["wq"].reshape(H, heads, dk).transpose(1, 0, 2).astype(mm)
    wk3 = params["wk"].reshape(H, heads, dk).transpose(1, 0, 2).astype(mm)
    wv3 = params["wv"].reshape(H, heads, dk).transpose(1, 0, 2).astype(mm)
    wo3 = params["wo"].reshape(heads, dk, H).astype(mm)
    bq3 = params["bq"].reshape(1, heads, dk).transpose(1, 0, 2).astype(f32)
    bk3 = params["bk"].reshape(1, heads, dk).transpose(1, 0, 2).astype(f32)
    bv3 = params["bv"].reshape(1, heads, dk).transpose(1, 0, 2).astype(f32)
    w1 = params["w1"].astype(mm)
    w2 = params["w2"].astype(mm)
    bo = params["bo"].astype(f32)
    b1 = params["b1"].astype(f32)
    b2 = params["b2"].astype(f32)
    ln_g = params["ln_g"].astype(f32)
    ln_b = params["ln_b"].astype(f32)

    # Additive attention mask (0 = attend, -1e9 = masked), computed once.
    mask_bias = jnp.where(mask == 0, jnp.float32(-1e9), jnp.float32(0.0))

    single = pl.Buffered(1)   # constant-index blocks: no double buffering -> half VMEM

    def head_w(shape):
        return pl.BlockSpec(shape, lambda b, qi, h: (h, 0, 0))

    def const2d(shape):
        return pl.BlockSpec(shape, lambda b, qi, h: (0, 0), pipeline_mode=single)

    in_specs = [
        pl.BlockSpec((1, tq, H), lambda b, qi, h: (b, qi, 0)),   # x (query rows)
        pl.BlockSpec((1, S, H), lambda b, qi, h: (b, 0, 0)),     # x (key/value rows)
        pl.BlockSpec((1, tq, S), lambda b, qi, h: (b, qi, 0)),   # additive mask
        head_w((1, H, dk)), head_w((1, 1, dk)),                  # wq, bq (per head)
        head_w((1, H, dk)), head_w((1, 1, dk)),                  # wk, bk (per head)
        head_w((1, H, dk)), head_w((1, 1, dk)),                  # wv, bv (per head)
        head_w((1, dk, H)), const2d((1, H)),                     # wo (per head), bo
        const2d((H, d_ff)), const2d((1, d_ff)),                  # w1, b1
        const2d((d_ff, H)), const2d((1, H)),                     # w2, b2
        const2d((1, H)), const2d((1, H)),                        # LN gamma, beta
    ]

    out_shape = [jax.ShapeDtypeStruct((B, S, H), jnp.float32)]
    out_specs = [pl.BlockSpec((1, tq, H), lambda b, qi, h: (b, qi, 0))]
    if return_attn:
        out_shape.append(jax.ShapeDtypeStruct((B, heads, S, S), attn_dtype))
        out_specs.append(pl.BlockSpec((1, 1, tq, S), lambda b, qi, h: (b, h, qi, 0)))

    kernel = functools.partial(
        _transformer_block_kernel, dk=dk, matmul_dtype=mm, return_attn=return_attn)

    results = pl.pallas_call(
        kernel,
        out_shape=tuple(out_shape),
        grid_spec=pltpu.PrefetchScalarGridSpec(
            num_scalar_prefetch=0,
            grid=(B, n_qt, heads),               # heads innermost: output-proj reduction
            in_specs=in_specs,
            out_specs=out_specs,
            scratch_shapes=[pltpu.VMEM((tq, H), jnp.float32)],   # attn-output accumulator
        ),
        compiler_params=pltpu.CompilerParams(
            dimension_semantics=("parallel", "parallel", "arbitrary"),
            vmem_limit_bytes=64 * 1024 * 1024,
        ),
    )(
        x, x, mask_bias,
        wq3, bq3, wk3, bk3, wv3, bv3, wo3, bo,
        w1, b1, w2, b2, ln_g, ln_b,
    )

    if return_attn:
        out, attn = results
        return out, attn
    (out,) = results
    return out, None


def _reference(x, mask, params, heads):
    """Pure-JAX f32 reference of the PyTorch module's forward (eval mode)."""
    B, S, H = x.shape
    dk = H // heads

    def ln(t):
        mean = t.mean(-1, keepdims=True)
        var = jnp.sum((t - mean) ** 2, -1, keepdims=True) / (H - 1)
        return params["ln_g"] * (t - mean) / (jnp.sqrt(var) + 1e-6) + params["ln_b"]

    q = x @ params["wq"] + params["bq"]
    k = x @ params["wk"] + params["bk"]
    v = x @ params["wv"] + params["bv"]
    split = lambda t: t.reshape(B, S, heads, dk).transpose(0, 2, 1, 3)
    qh, kh, vh = split(q), split(k), split(v)
    scores = jnp.einsum("bhqd,bhkd->bhqk", qh, kh) / jnp.sqrt(jnp.float32(dk))
    scores = jnp.where(mask[:, None] == 0, jnp.float32(-1e9), scores)
    p = jax.nn.softmax(scores, axis=-1)
    ctx = jnp.einsum("bhqk,bhkd->bhqd", p, vh).transpose(0, 2, 1, 3).reshape(B, S, H)
    att = ctx @ params["wo"] + params["bo"]
    sub1 = x + ln(att)
    h1 = _gelu(sub1 @ params["w1"] + params["b1"])
    ffn = h1 @ params["w2"] + params["b2"]
    return ln(sub1 + ffn), p


if __name__ == "__main__":
    # Small shapes implied by the module: hidden=32, attn_heads=4, ff=4*hidden, seq=8.
    B, S, H, HEADS = 2, 8, 32, 4
    D_FF = 4 * H

    key = jax.random.PRNGKey(0)
    ks = jax.random.split(key, 16)
    init = lambda k, shape: 0.02 * jax.random.normal(k, shape, jnp.float32)

    params = {
        "wq": init(ks[0], (H, H)), "bq": init(ks[1], (1, H)),
        "wk": init(ks[2], (H, H)), "bk": init(ks[3], (1, H)),
        "wv": init(ks[4], (H, H)), "bv": init(ks[5], (1, H)),
        "wo": init(ks[6], (H, H)), "bo": init(ks[7], (1, H)),
        "w1": init(ks[8], (H, D_FF)), "b1": init(ks[9], (1, D_FF)),
        "w2": init(ks[10], (D_FF, H)), "b2": init(ks[11], (1, H)),
        "ln_g": jnp.ones((1, H), jnp.float32),
        "ln_b": jnp.zeros((1, H), jnp.float32),
    }

    x = jax.random.normal(ks[12], (B, S, H), jnp.float32)
    # Key-padding style mask: batch 0 attends to all 8 keys, batch 1 to first 6.
    lengths = jnp.array([8, 6], jnp.int32)
    mask = (jnp.arange(S)[None, None, :] < lengths[:, None, None]).astype(jnp.float32)
    mask = jnp.broadcast_to(mask, (B, S, S))

    out, attn = transformer_block(x, mask, params, heads=HEADS)
    jax.block_until_ready((out, attn))

    assert out.shape == (B, S, H) and attn.shape == (B, HEADS, S, S)
    assert bool(jnp.all(jnp.isfinite(out)))

    # Loose tolerance: kernel uses bf16 MXU inputs (f32 accumulation) + approx reciprocal.
    ref_out, ref_attn = _reference(x, mask, params, HEADS)
    assert bool(jnp.allclose(out, ref_out, atol=5e-2, rtol=5e-2)), \
        float(jnp.max(jnp.abs(out - ref_out)))
    assert bool(jnp.allclose(attn, ref_attn, atol=2e-2, rtol=2e-2)), \
        float(jnp.max(jnp.abs(attn - ref_attn)))

    print("KERNEL_OK")
</pallas_src>

<mosaic_0001>
module attributes {stable_mosaic.version = 11 : i64} {
  func.func @_transformer_block_kernel(%arg0: i32, %arg1: i32, %arg2: i32, %arg3: memref<1x8x32xf32, #tpu.memory_space<vmem>>, %arg4: memref<1x8x32xf32, #tpu.memory_space<vmem>>, %arg5: memref<1x8x8xf32, #tpu.memory_space<vmem>>, %arg6: memref<1x32x8xbf16, #tpu.memory_space<vmem>>, %arg7: memref<1x1x8xf32, #tpu.memory_space<vmem>>, %arg8: memref<1x32x8xbf16, #tpu.memory_space<vmem>>, %arg9: memref<1x1x8xf32, #tpu.memory_space<vmem>>, %arg10: memref<1x32x8xbf16, #tpu.memory_space<vmem>>, %arg11: memref<1x1x8xf32, #tpu.memory_space<vmem>>, %arg12: memref<1x8x32xbf16, #tpu.memory_space<vmem>>, %arg13: memref<1x32xf32, #tpu.memory_space<vmem>>, %arg14: memref<32x128xbf16, #tpu.memory_space<vmem>>, %arg15: memref<1x128xf32, #tpu.memory_space<vmem>>, %arg16: memref<128x32xbf16, #tpu.memory_space<vmem>>, %arg17: memref<1x32xf32, #tpu.memory_space<vmem>>, %arg18: memref<1x32xf32, #tpu.memory_space<vmem>>, %arg19: memref<1x32xf32, #tpu.memory_space<vmem>>, %arg20: memref<1x8x32xf32, #tpu.memory_space<vmem>>, %arg21: memref<1x1x8x8xf32, #tpu.memory_space<vmem>>, %arg22: memref<8x32xf32, #tpu.memory_space<vmem>>) attributes {dimension_semantics = [#tpu.dimension_semantics<parallel>, #tpu.dimension_semantics<parallel>, #tpu.dimension_semantics<arbitrary>], iteration_bounds = array<i64: 2, 1, 4>, scalar_prefetch = 0 : i64, scratch_operands = 1 : i64, tpu.core_type = #tpu.core_type<tc>, window_params = [{transform_indices = @transform_0, window_bounds = array<i64: 1, 8, 32>}, {transform_indices = @transform_1, window_bounds = array<i64: 1, 8, 32>}, {transform_indices = @transform_2, window_bounds = array<i64: 1, 8, 8>}, {transform_indices = @transform_3, window_bounds = array<i64: 1, 32, 8>}, {transform_indices = @transform_4, window_bounds = array<i64: 1, 1, 8>}, {transform_indices = @transform_5, window_bounds = array<i64: 1, 32, 8>}, {transform_indices = @transform_6, window_bounds = array<i64: 1, 1, 8>}, {transform_indices = @transform_7, window_bounds = array<i64: 1, 32, 8>}, {transform_indices = @transform_8, window_bounds = array<i64: 1, 1, 8>}, {transform_indices = @transform_9, window_bounds = array<i64: 1, 8, 32>}, {pipeline_mode = #tpu.pipeline_mode<synchronous>, transform_indices = @transform_10, window_bounds = array<i64: 1, 32>}, {pipeline_mode = #tpu.pipeline_mode<synchronous>, transform_indices = @transform_11, window_bounds = array<i64: 32, 128>}, {pipeline_mode = #tpu.pipeline_mode<synchronous>, transform_indices = @transform_12, window_bounds = array<i64: 1, 128>}, {pipeline_mode = #tpu.pipeline_mode<synchronous>, transform_indices = @transform_13, window_bounds = array<i64: 128, 32>}, {pipeline_mode = #tpu.pipeline_mode<synchronous>, transform_indices = @transform_14, window_bounds = array<i64: 1, 32>}, {pipeline_mode = #tpu.pipeline_mode<synchronous>, transform_indices = @transform_15, window_bounds = array<i64: 1, 32>}, {pipeline_mode = #tpu.pipeline_mode<synchronous>, transform_indices = @transform_16, window_bounds = array<i64: 1, 32>}, {transform_indices = @transform_17, window_bounds = array<i64: 1, 8, 32>}, {transform_indices = @transform_18, window_bounds = array<i64: 1, 1, 8, 8>}]} {
    %c0_i32 = arith.constant 0 : i32
    %0 = arith.cmpi eq, %arg2, %c0_i32 : i32
    %1 = arith.extui %0 : i1 to i32
    %c0_i32_0 = arith.constant 0 : i32
    %2 = arith.cmpi ne, %1, %c0_i32_0 : i32
    scf.if %2 {
      %cst_47 = arith.constant 0.000000e+00 : f32
      %64 = vector.broadcast %cst_47 : f32 to vector<8x32xf32>
      %c0_48 = arith.constant 0 : index
      %c0_49 = arith.constant 0 : index
      %65 = vector.load %arg22[%c0_48, %c0_49] : memref<8x32xf32, #tpu.memory_space<vmem>>, vector<8x32xf32>
      tpu.vector_store %arg22[%c0_48, %c0_49], %64 {strides = array<i32>} : memref<8x32xf32, #tpu.memory_space<vmem>>, vector<8x32xf32>,
    } else {
    }
    %c0 = arith.constant 0 : index
    %c0_1 = arith.constant 0 : index
    %c0_2 = arith.constant 0 : index
    %3 = vector.load %arg3[%c0, %c0_1, %c0_2] : memref<1x8x32xf32, #tpu.memory_space<vmem>>, vector<1x8x32xf32>
    %4 = vector.shape_cast %3 : vector<1x8x32xf32> to vector<8x32xf32>
    %5 = arith.truncf %4 : vector<8x32xf32> to vector<8x32xbf16>
    %c0_3 = arith.constant 0 : index
    %c0_4 = arith.constant 0 : index
    %c0_5 = arith.constant 0 : index
    %6 = vector.load %arg4[%c0_3, %c0_4, %c0_5] : memref<1x8x32xf32, #tpu.memory_space<vmem>>, vector<1x8x32xf32>
    %7 = vector.shape_cast %6 : vector<1x8x32xf32> to vector<8x32xf32>
    %8 = arith.truncf %7 : vector<8x32xf32> to vector<8x32xbf16>
    %c0_6 = arith.constant 0 : index
    %c0_7 = arith.constant 0 : index
    %c0_8 = arith.constant 0 : index
    %9 = vector.load %arg6[%c0_6, %c0_7, %c0_8] : memref<1x32x8xbf16, #tpu.memory_space<vmem>>, vector<1x32x8xbf16>
    %10 = vector.shape_cast %9 : vector<1x32x8xbf16> to vector<32x8xbf16>
    %cst = arith.constant dense<0.000000e+00> : vector<8x8xf32>
    %11 = tpu.matmul %5, %10, %cst {dimension_numbers = #tpu.dot_dimension_numbers<[1], [0], [0], [1], [0, 0, 1, 1], [], []>} : vector<8x32xbf16>, vector<32x8xbf16>, vector<8x8xf32> -> vector<8x8xf32>
    %c0_9 = arith.constant 0 : index
    %c0_10 = arith.constant 0 : index
    %c0_11 = arith.constant 0 : index
    %12 = vector.load %arg7[%c0_9, %c0_10, %c0_11] : memref<1x1x8xf32, #tpu.memory_space<vmem>>, vector<1x1x8xf32>
    %13 = vector.shape_cast %12 : vector<1x1x8xf32> to vector<1x8xf32>
    %14 = vector.broadcast %13 : vector<1x8xf32> to vector<8x8xf32>
    %15 = arith.addf %11, %14 : vector<8x8xf32>
    %c0_12 = arith.constant 0 : index
    %c0_13 = arith.constant 0 : index
    %c0_14 = arith.constant 0 : index
    %16 = vector.load %arg8[%c0_12, %c0_13, %c0_14] : memref<1x32x8xbf16, #tpu.memory_space<vmem>>, vector<1x32x8xbf16>
    %17 = vector.shape_cast %16 : vector<1x32x8xbf16> to vector<32x8xbf16>
    %cst_15 = arith.constant dense<0.000000e+00> : vector<8x8xf32>
    %18 = tpu.matmul %8, %17, %cst_15 {dimension_numbers = #tpu.dot_dimension_numbers<[1], [0], [0], [1], [0, 0, 1, 1], [], []>} : vector<8x32xbf16>, vector<32x8xbf16>, vector<8x8xf32> -> vector<8x8xf32>
    %c0_16 = arith.constant 0 : index
    %c0_17 = arith.constant 0 : index
    %c0_18 = arith.constant 0 : index
    %19 = vector.load %arg9[%c0_16, %c0_17, %c0_18] : memref<1x1x8xf32, #tpu.memory_space<vmem>>, vector<1x1x8xf32>
    %20 = vector.shape_cast %19 : vector<1x1x8xf32> to vector<1x8xf32>
    %21 = vector.broadcast %20 : vector<1x8xf32> to vector<8x8xf32>
    %22 = arith.addf %18, %21 : vector<8x8xf32>
    %c0_19 = arith.constant 0 : index
    %c0_20 = arith.constant 0 : index
    %c0_21 = arith.constant 0 : index
    %23 = vector.load %arg10[%c0_19, %c0_20, %c0_21] : memref<1x32x8xbf16, #tpu.memory_space<vmem>>, vector<1x32x8xbf16>
    %24 = vector.shape_cast %23 : vector<1x32x8xbf16> to vector<32x8xbf16>
    %cst_22 = arith.constant dense<0.000000e+00> : vector<8x8xf32>
    %25 = tpu.matmul %8, %24, %cst_22 {dimension_numbers = #tpu.dot_dimension_numbers<[1], [0], [0], [1], [0, 0, 1, 1], [], []>} : vector<8x32xbf16>, vector<32x8xbf16>, vector<8x8xf32> -> vector<8x8xf32>
    %c0_23 = arith.constant 0 : index
    %c0_24 = arith.constant 0 : index
    %c0_25 = arith.constant 0 : index
    %26 = vector.load %arg11[%c0_23, %c0_24, %c0_25] : memref<1x1x8xf32, #tpu.memory_space<vmem>>, vector<1x1x8xf32>
    %27 = vector.shape_cast %26 : vector<1x1x8xf32> to vector<1x8xf32>
    %28 = vector.broadcast %27 : vector<1x8xf32> to vector<8x8xf32>
    %29 = arith.addf %25, %28 : vector<8x8xf32>
    %30 = arith.truncf %15 : vector<8x8xf32> to vector<8x8xbf16>
    %31 = arith.truncf %22 : vector<8x8xf32> to vector<8x8xbf16>
    %cst_26 = arith.constant dense<0.000000e+00> : vector<8x8xf32>
    %32 = tpu.matmul %30, %31, %cst_26 {dimension_numbers = #tpu.dot_dimension_numbers<[1], [1], [0], [0], [0, 0, 1, 0], [], []>} : vector<8x8xbf16>, vector<8x8xbf16>, vector<8x8xf32> -> vector<8x8xf32>
    %cst_27 = arith.constant 0.353553385 : f32
    %33 = vector.broadcast %cst_27 : f32 to vector<8x8xf32>
    %34 = arith.mulf %32, %33 : vector<8x8xf32>
    %c0_28 = arith.constant 0 : index
    %c0_29 = arith.constant 0 : index
    %c0_30 = arith.constant 0 : index
    %35 = vector.load %arg5[%c0_28, %c0_29, %c0_30] : memref<1x8x8xf32, #tpu.memory_space<vmem>>, vector<1x8x8xf32>
    %36 = vector.shape_cast %35 : vector<1x8x8xf32> to vector<8x8xf32>
    %37 = arith.addf %34, %36 : vector<8x8xf32>
    %cst_31 = arith.constant dense<0xFF800000> : vector<8xf32>
    %38 = vector.multi_reduction <maximumf>, %37, %cst_31 [1] : vector<8x8xf32> to vector<8xf32>
    %39 = vector.shape_cast %38 : vector<8xf32> to vector<8x1xf32>
    %40 = vector.broadcast %39 : vector<8x1xf32> to vector<8x8xf32>
    %41 = arith.subf %37, %40 : vector<8x8xf32>
    %42 = math.exp %41 : vector<8x8xf32>
    %cst_32 = arith.constant dense<0.000000e+00> : vector<8xf32>
    %43 = vector.multi_reduction <add>, %42, %cst_32 [1] : vector<8x8xf32> to vector<8xf32>
    %44 = vector.shape_cast %43 : vector<8xf32> to vector<8x1xf32>
    %45 = tpu.reciprocal %44 {approx = true} : vector<8x1xf32> -> vector<8x1xf32>
    %46 = vector.broadcast %45 : vector<8x1xf32> to vector<8x8xf32>
    %47 = arith.mulf %42, %46 : vector<8x8xf32>
    %c0_33 = arith.constant 0 : index
    %c0_34 = arith.constant 0 : index
    %c0_35 = arith.constant 0 : index
    %c0_36 = arith.constant 0 : index
    %48 = vector.load %arg21[%c0_33, %c0_34, %c0_35, %c0_36] : memref<1x1x8x8xf32, #tpu.memory_space<vmem>>, vector<1x1x8x8xf32>
    %49 = vector.shape_cast %48 : vector<1x1x8x8xf32> to vector<8x8xf32>
    %50 = vector.shape_cast %47 : vector<8x8xf32> to vector<1x1x8x8xf32>
    tpu.vector_store %arg21[%c0_33, %c0_34, %c0_35, %c0_36], %50 {strides = array<i32>} : memref<1x1x8x8xf32, #tpu.memory_space<vmem>>, vector<1x1x8x8xf32>,
    %51 = arith.truncf %47 : vector<8x8xf32> to vector<8x8xbf16>
    %52 = arith.truncf %29 : vector<8x8xf32> to vector<8x8xbf16>
    %cst_37 = arith.constant dense<0.000000e+00> : vector<8x8xf32>
    %53 = tpu.matmul %51, %52, %cst_37 {dimension_numbers = #tpu.dot_dimension_numbers<[1], [0], [0], [1], [0, 0, 1, 1], [], []>} : vector<8x8xbf16>, vector<8x8xbf16>, vector<8x8xf32> -> vector<8x8xf32>
    %c0_38 = arith.constant 0 : index
    %c0_39 = arith.constant 0 : index
    %54 = vector.load %arg22[%c0_38, %c0_39] : memref<8x32xf32, #tpu.memory_space<vmem>>, vector<8x32xf32>
    %55 = arith.truncf %53 : vector<8x8xf32> to vector<8x8xbf16>
    %c0_40 = arith.constant 0 : index
    %c0_41 = arith.constant 0 : index
    %c0_42 = arith.constant 0 : index
    %56 = vector.load %arg12[%c0_40, %c0_41, %c0_42] : memref<1x8x32xbf16, #tpu.memory_space<vmem>>, vector<1x8x32xbf16>
    %57 = vector.shape_cast %56 : vector<1x8x32xbf16> to vector<8x32xbf16>
    %cst_43 = arith.constant dense<0.000000e+00> : vector<8x32xf32>
    %58 = tpu.matmul %55, %57, %cst_43 {dimension_numbers = #tpu.dot_dimension_numbers<[1], [0], [0], [1], [0, 0, 1, 1], [], []>} : vector<8x8xbf16>, vector<8x32xbf16>, vector<8x32xf32> -> vector<8x32xf32>
    %59 = arith.addf %54, %58 : vector<8x32xf32>
    %c0_44 = arith.constant 0 : index
    %c0_45 = arith.constant 0 : index
    %60 = vector.load %arg22[%c0_44, %c0_45] : memref<8x32xf32, #tpu.memory_space<vmem>>, vector<8x32xf32>
    tpu.vector_store %arg22[%c0_44, %c0_45], %59 {strides = array<i32>} : memref<8x32xf32, #tpu.memory_space<vmem>>, vector<8x32xf32>,
    %c3_i32 = arith.constant 3 : i32
    %61 = arith.cmpi eq, %arg2, %c3_i32 : i32
    %62 = arith.extui %61 : i1 to i32
    %c0_i32_46 = arith.constant 0 : i32
    %63 = arith.cmpi ne, %62, %c0_i32_46 : i32
    scf.if %63 {
      %c0_47 = arith.constant 0 : index
      %c0_48 = arith.constant 0 : index
      %64 = vector.load %arg18[%c0_47, %c0_48] : memref<1x32xf32, #tpu.memory_space<vmem>>, vector<1x32xf32>
      %c0_49 = arith.constant 0 : index
      %c0_50 = arith.constant 0 : index
      %65 = vector.load %arg19[%c0_49, %c0_50] : memref<1x32xf32, #tpu.memory_space<vmem>>, vector<1x32xf32>
      %c0_51 = arith.constant 0 : index
      %c0_52 = arith.constant 0 : index
      %66 = vector.load %arg22[%c0_51, %c0_52] : memref<8x32xf32, #tpu.memory_space<vmem>>, vector<8x32xf32>
      %c0_53 = arith.constant 0 : index
      %c0_54 = arith.constant 0 : index
      %67 = vector.load %arg13[%c0_53, %c0_54] : memref<1x32xf32, #tpu.memory_space<vmem>>, vector<1x32xf32>
      %68 = vector.broadcast %67 : vector<1x32xf32> to vector<8x32xf32>
      %69 = arith.addf %66, %68 : vector<8x32xf32>
      %cst_55 = arith.constant dense<0.000000e+00> : vector<8xf32>
      %70 = vector.multi_reduction <add>, %69, %cst_55 [1] : vector<8x32xf32> to vector<8xf32>
      %71 = vector.shape_cast %70 : vector<8xf32> to vector<8x1xf32>
      %cst_56 = arith.constant 3.200000e+01 : f32
      %72 = vector.broadcast %cst_56 : f32 to vector<8x1xf32>
      %73 = arith.divf %71, %72 : vector<8x1xf32>
      %74 = vector.broadcast %73 : vector<8x1xf32> to vector<8x32xf32>
      %75 = arith.subf %69, %74 : vector<8x32xf32>
      %76 = arith.mulf %75, %75 : vector<8x32xf32>
      %cst_57 = arith.constant dense<0.000000e+00> : vector<8xf32>
      %77 = vector.multi_reduction <add>, %76, %cst_57 [1] : vector<8x32xf32> to vector<8xf32>
      %78 = vector.shape_cast %77 : vector<8xf32> to vector<8x1xf32>
      %cst_58 = arith.constant 0.0322580636 : f32
      %79 = vector.broadcast %cst_58 : f32 to vector<8x1xf32>
      %80 = arith.mulf %78, %79 : vector<8x1xf32>
      %81 = math.sqrt %80 : vector<8x1xf32>
      %cst_59 = arith.constant 9.99999997E-7 : f32
      %82 = vector.broadcast %cst_59 : f32 to vector<8x1xf32>
      %83 = arith.addf %81, %82 : vector<8x1xf32>
      %84 = tpu.reciprocal %83 {approx = true} : vector<8x1xf32> -> vector<8x1xf32>
      %85 = vector.broadcast %84 : vector<8x1xf32> to vector<8x32xf32>
      %86 = arith.mulf %75, %85 : vector<8x32xf32>
      %87 = vector.broadcast %64 : vector<1x32xf32> to vector<8x32xf32>
      %88 = arith.mulf %87, %86 : vector<8x32xf32>
      %89 = vector.broadcast %65 : vector<1x32xf32> to vector<8x32xf32>
      %90 = arith.addf %88, %89 : vector<8x32xf32>
      %91 = arith.addf %4, %90 : vector<8x32xf32>
      %92 = arith.truncf %91 : vector<8x32xf32> to vector<8x32xbf16>
      %c0_60 = arith.constant 0 : index
      %c0_61 = arith.constant 0 : index
      %93 = vector.load %arg14[%c0_60, %c0_61] : memref<32x128xbf16, #tpu.memory_space<vmem>>, vector<32x128xbf16>
      %cst_62 = arith.constant dense<0.000000e+00> : vector<8x128xf32>
      %94 = tpu.matmul %92, %93, %cst_62 {dimension_numbers = #tpu.dot_dimension_numbers<[1], [0], [0], [1], [0, 0, 1, 1], [], []>} : vector<8x32xbf16>, vector<32x128xbf16>, vector<8x128xf32> -> vector<8x128xf32>
      %c0_63 = arith.constant 0 : index
      %c0_64 = arith.constant 0 : index
      %95 = vector.load %arg15[%c0_63, %c0_64] : memref<1x128xf32, #tpu.memory_space<vmem>>, vector<1x128xf32>
      %96 = vector.broadcast %95 : vector<1x128xf32> to vector<8x128xf32>
      %97 = arith.addf %94, %96 : vector<8x128xf32>
      %cst_65 = arith.constant 5.000000e-01 : f32
      %98 = vector.broadcast %cst_65 : f32 to vector<8x128xf32>
      %99 = arith.mulf %98, %97 : vector<8x128xf32>
      %cst_66 = arith.constant 4.471500e-02 : f32
      %100 = vector.broadcast %cst_66 : f32 to vector<8x128xf32>
      %101 = arith.mulf %100, %97 : vector<8x128xf32>
      %102 = arith.mulf %101, %97 : vector<8x128xf32>
      %103 = arith.mulf %102, %97 : vector<8x128xf32>
      %104 = arith.addf %97, %103 : vector<8x128xf32>
      %cst_67 = arith.constant 0.797884583 : f32
      %105 = vector.broadcast %cst_67 : f32 to vector<8x128xf32>
      %106 = arith.mulf %105, %104 : vector<8x128xf32>
      %107 = math.tanh %106 : vector<8x128xf32>
      %cst_68 = arith.constant 1.000000e+00 : f32
      %108 = vector.broadcast %cst_68 : f32 to vector<8x128xf32>
      %109 = arith.addf %108, %107 : vector<8x128xf32>
      %110 = arith.mulf %99, %109 : vector<8x128xf32>
      %111 = arith.truncf %110 : vector<8x128xf32> to vector<8x128xbf16>
      %c0_69 = arith.constant 0 : index
      %c0_70 = arith.constant 0 : index
      %112 = vector.load %arg16[%c0_69, %c0_70] : memref<128x32xbf16, #tpu.memory_space<vmem>>, vector<128x32xbf16>
      %cst_71 = arith.constant dense<0.000000e+00> : vector<8x32xf32>
      %113 = tpu.matmul %111, %112, %cst_71 {dimension_numbers = #tpu.dot_dimension_numbers<[1], [0], [0], [1], [0, 0, 1, 1], [], []>} : vector<8x128xbf16>, vector<128x32xbf16>, vector<8x32xf32> -> vector<8x32xf32>
      %c0_72 = arith.constant 0 : index
      %c0_73 = arith.constant 0 : index
      %114 = vector.load %arg17[%c0_72, %c0_73] : memref<1x32xf32, #tpu.memory_space<vmem>>, vector<1x32xf32>
      %115 = vector.broadcast %114 : vector<1x32xf32> to vector<8x32xf32>
      %116 = arith.addf %113, %115 : vector<8x32xf32>
      %117 = arith.addf %91, %116 : vector<8x32xf32>
      %cst_74 = arith.constant dense<0.000000e+00> : vector<8xf32>
      %118 = vector.multi_reduction <add>, %117, %cst_74 [1] : vector<8x32xf32> to vector<8xf32>
      %119 = vector.shape_cast %118 : vector<8xf32> to vector<8x1xf32>
      %cst_75 = arith.constant 3.200000e+01 : f32
      %120 = vector.broadcast %cst_75 : f32 to vector<8x1xf32>
      %121 = arith.divf %119, %120 : vector<8x1xf32>
      %122 = vector.broadcast %121 : vector<8x1xf32> to vector<8x32xf32>
      %123 = arith.subf %117, %122 : vector<8x32xf32>
      %124 = arith.mulf %123, %123 : vector<8x32xf32>
      %cst_76 = arith.constant dense<0.000000e+00> : vector<8xf32>
      %125 = vector.multi_reduction <add>, %124, %cst_76 [1] : vector<8x32xf32> to vector<8xf32>
      %126 = vector.shape_cast %125 : vector<8xf32> to vector<8x1xf32>
      %cst_77 = arith.constant 0.0322580636 : f32
      %127 = vector.broadcast %cst_77 : f32 to vector<8x1xf32>
      %128 = arith.mulf %126, %127 : vector<8x1xf32>
      %129 = math.sqrt %128 : vector<8x1xf32>
      %cst_78 = arith.constant 9.99999997E-7 : f32
      %130 = vector.broadcast %cst_78 : f32 to vector<8x1xf32>
      %131 = arith.addf %129, %130 : vector<8x1xf32>
      %132 = tpu.reciprocal %131 {approx = true} : vector<8x1xf32> -> vector<8x1xf32>
      %133 = vector.broadcast %132 : vector<8x1xf32> to vector<8x32xf32>
      %134 = arith.mulf %123, %133 : vector<8x32xf32>
      %135 = vector.broadcast %64 : vector<1x32xf32> to vector<8x32xf32>
      %136 = arith.mulf %135, %134 : vector<8x32xf32>
      %137 = vector.broadcast %65 : vector<1x32xf32> to vector<8x32xf32>
      %138 = arith.addf %136, %137 : vector<8x32xf32>
      %c0_79 = arith.constant 0 : index
      %c0_80 = arith.constant 0 : index
      %c0_81 = arith.constant 0 : index
      %139 = vector.load %arg20[%c0_79, %c0_80, %c0_81] : memref<1x8x32xf32, #tpu.memory_space<vmem>>, vector<1x8x32xf32>
      %140 = vector.shape_cast %139 : vector<1x8x32xf32> to vector<8x32xf32>
      %141 = vector.shape_cast %138 : vector<8x32xf32> to vector<1x8x32xf32>
      tpu.vector_store %arg20[%c0_79, %c0_80, %c0_81], %141 {strides = array<i32>} : memref<1x8x32xf32, #tpu.memory_space<vmem>>, vector<1x8x32xf32>,
    } else {
    }
    return
  }
  func.func @transform_0(%arg0: i32, %arg1: i32, %arg2: i32) -> (i32, i32, i32) {
    %c0_i32 = arith.constant 0 : i32
    %c0_i32_0 = arith.constant 0 : i32
    return %arg0, %arg1, %c0_i32 : i32, i32, i32
  }
  func.func @transform_1(%arg0: i32, %arg1: i32, %arg2: i32) -> (i32, i32, i32) {
    %c0_i32 = arith.constant 0 : i32
    %c0_i32_0 = arith.constant 0 : i32
    %c0_i32_1 = arith.constant 0 : i32
    return %arg0, %c0_i32, %c0_i32_0 : i32, i32, i32
  }
  func.func @transform_2(%arg0: i32, %arg1: i32, %arg2: i32) -> (i32, i32, i32) {
    %c0_i32 = arith.constant 0 : i32
    %c0_i32_0 = arith.constant 0 : i32
    return %arg0, %arg1, %c0_i32 : i32, i32, i32
  }
  func.func @transform_3(%arg0: i32, %arg1: i32, %arg2: i32) -> (i32, i32, i32) {
    %c0_i32 = arith.constant 0 : i32
    %c0_i32_0 = arith.constant 0 : i32
    %c0_i32_1 = arith.constant 0 : i32
    return %arg2, %c0_i32, %c0_i32_0 : i32, i32, i32
  }
  func.func @transform_4(%arg0: i32, %arg1: i32, %arg2: i32) -> (i32, i32, i32) {
    %c0_i32 = arith.constant 0 : i32
    %c0_i32_0 = arith.constant 0 : i32
    %c0_i32_1 = arith.constant 0 : i32
    return %arg2, %c0_i32, %c0_i32_0 : i32, i32, i32
  }
  func.func @transform_5(%arg0: i32, %arg1: i32, %arg2: i32) -> (i32, i32, i32) {
    %c0_i32 = arith.constant 0 : i32
    %c0_i32_0 = arith.constant 0 : i32
    %c0_i32_1 = arith.constant 0 : i32
    return %arg2, %c0_i32, %c0_i32_0 : i32, i32, i32
  }
  func.func @transform_6(%arg0: i32, %arg1: i32, %arg2: i32) -> (i32, i32, i32) {
    %c0_i32 = arith.constant 0 : i32
    %c0_i32_0 = arith.constant 0 : i32
    %c0_i32_1 = arith.constant 0 : i32
    return %arg2, %c0_i32, %c0_i32_0 : i32, i32, i32
  }
  func.func @transform_7(%arg0: i32, %arg1: i32, %arg2: i32) -> (i32, i32, i32) {
    %c0_i32 = arith.constant 0 : i32
    %c0_i32_0 = arith.constant 0 : i32
    %c0_i32_1 = arith.constant 0 : i32
    return %arg2, %c0_i32, %c0_i32_0 : i32, i32, i32
  }
  func.func @transform_8(%arg0: i32, %arg1: i32, %arg2: i32) -> (i32, i32, i32) {
    %c0_i32 = arith.constant 0 : i32
    %c0_i32_0 = arith.constant 0 : i32
    %c0_i32_1 = arith.constant 0 : i32
    return %arg2, %c0_i32, %c0_i32_0 : i32, i32, i32
  }
  func.func @transform_9(%arg0: i32, %arg1: i32, %arg2: i32) -> (i32, i32, i32) {
    %c0_i32 = arith.constant 0 : i32
    %c0_i32_0 = arith.constant 0 : i32
    %c0_i32_1 = arith.constant 0 : i32
    return %arg2, %c0_i32, %c0_i32_0 : i32, i32, i32
  }
  func.func @transform_10(%arg0: i32, %arg1: i32, %arg2: i32) -> (i32, i32) {
    %c0_i32 = arith.constant 0 : i32
    %c0_i32_0 = arith.constant 0 : i32
    %c0_i32_1 = arith.constant 0 : i32
    return %c0_i32, %c0_i32_0 : i32, i32
  }
  func.func @transform_11(%arg0: i32, %arg1: i32, %arg2: i32) -> (i32, i32) {
    %c0_i32 = arith.constant 0 : i32
    %c0_i32_0 = arith.constant 0 : i32
    %c0_i32_1 = arith.constant 0 : i32
    return %c0_i32, %c0_i32_0 : i32, i32
  }
  func.func @transform_12(%arg0: i32, %arg1: i32, %arg2: i32) -> (i32, i32) {
    %c0_i32 = arith.constant 0 : i32
    %c0_i32_0 = arith.constant 0 : i32
    %c0_i32_1 = arith.constant 0 : i32
    return %c0_i32, %c0_i32_0 : i32, i32
  }
  func.func @transform_13(%arg0: i32, %arg1: i32, %arg2: i32) -> (i32, i32) {
    %c0_i32 = arith.constant 0 : i32
    %c0_i32_0 = arith.constant 0 : i32
    %c0_i32_1 = arith.constant 0 : i32
    return %c0_i32, %c0_i32_0 : i32, i32
  }
  func.func @transform_14(%arg0: i32, %arg1: i32, %arg2: i32) -> (i32, i32) {
    %c0_i32 = arith.constant 0 : i32
    %c0_i32_0 = arith.constant 0 : i32
    %c0_i32_1 = arith.constant 0 : i32
    return %c0_i32, %c0_i32_0 : i32, i32
  }
  func.func @transform_15(%arg0: i32, %arg1: i32, %arg2: i32) -> (i32, i32) {
    %c0_i32 = arith.constant 0 : i32
    %c0_i32_0 = arith.constant 0 : i32
    %c0_i32_1 = arith.constant 0 : i32
    return %c0_i32, %c0_i32_0 : i32, i32
  }
  func.func @transform_16(%arg0: i32, %arg1: i32, %arg2: i32) -> (i32, i32) {
    %c0_i32 = arith.constant 0 : i32
    %c0_i32_0 = arith.constant 0 : i32
    %c0_i32_1 = arith.constant 0 : i32
    return %c0_i32, %c0_i32_0 : i32, i32
  }
  func.func @transform_17(%arg0: i32, %arg1: i32, %arg2: i32) -> (i32, i32, i32) {
    %c0_i32 = arith.constant 0 : i32
    %c0_i32_0 = arith.constant 0 : i32
    return %arg0, %arg1, %c0_i32 : i32, i32, i32
  }
  func.func @transform_18(%arg0: i32, %arg1: i32, %arg2: i32) -> (i32, i32, i32, i32) {
    %c0_i32 = arith.constant 0 : i32
    %c0_i32_0 = arith.constant 0 : i32
    return %arg0, %arg2, %arg1, %c0_i32 : i32, i32, i32, i32
  }
}

</mosaic_0001>

<bundles_post_ra>
// kernel: tpu_custom_call.1
= control target key start
LH: loop header
LB: loop body
LE: loop exit
PB: predicated region body
PF: predicated region fallthrough
CT: control target
= control target key end

     0   :  { %s2589_s0 = inlined_call_operand.vmem [shape: f32[2,8,32], index: 0, kind: input, shape index: {}]   ;;  %s2590_s1 = inlined_call_operand.vmem [shape: f32[2,8,32], index: 1, kind: input, shape index: {}]   ;;  %s2591_s2 = inlined_call_operand.vmem [shape: f32[2,8,8], index: 2, kind: input, shape index: {}]   ;;  %s2592_s3 = inlined_call_operand.vmem [shape: bf16[4,32,8], index: 3, kind: input, shape index: {}]   ;;  %s2593_s4 = inlined_call_operand.vmem [shape: f32[4,1,8], index: 4, kind: input, shape index: {}]   ;;  %s2594_s5 = inlined_call_operand.vmem [shape: bf16[4,32,8], index: 5, kind: input, shape index: {}]   ;;  %s2595_s6 = inlined_call_operand.vmem [shape: f32[4,1,8], index: 6, kind: input, shape index: {}]   ;;  %s2596_s7 = inlined_call_operand.vmem [shape: bf16[4,32,8], index: 7, kind: input, shape index: {}]   ;;  %s2597_s8 = inlined_call_operand.vmem [shape: f32[4,1,8], index: 8, kind: input, shape index: {}]   ;;  %s2598_s9 = inlined_call_operand.vmem [shape: bf16[4,8,32], index: 9, kind: input, shape index: {}]   ;;  %s2599_s10 = inlined_call_operand.vmem [shape: f32[1,32], index: 10, kind: input, shape index: {}]   ;;  %s2600_s11 = inlined_call_operand.vmem [shape: bf16[32,128], index: 11, kind: input, shape index: {}]   ;;  %s2601_s12 = inlined_call_operand.vmem [shape: f32[1,128], index: 12, kind: input, shape index: {}]   ;;  %s2602_s13 = inlined_call_operand.vmem [shape: bf16[128,32], index: 13, kind: input, shape index: {}]   ;;  %s2603_s14 = inlined_call_operand.vmem [shape: f32[1,32], index: 14, kind: input, shape index: {}]   ;;  %s2604_s15 = inlined_call_operand.vmem [shape: f32[1,32], index: 15, kind: input, shape index: {}]   ;;  %s2605_s16 = inlined_call_operand.vmem [shape: f32[1,32], index: 16, kind: input, shape index: {}]   ;;  %s2606_s17 = inlined_call_operand.hbm [shape: f32[2,8,32], index: 17, kind: output, shape index: {0}]   ;;  %s2607_s18 = inlined_call_operand.hbm [shape: f32[2,4,8,8], index: 18, kind: output, shape index: {1}]  }
   0x1   :  { %2634 = sst [smem:[#allocation27_spill]] %s2589_s0 }
   0x2   :  { %2635 = sst [smem:[#allocation28_spill]] %s2590_s1 }
   0x3   :  { %2636 = sst [smem:[#allocation29_spill]] %s2591_s2 }
   0x4   :  { %2637 = sst [smem:[#allocation30_spill]] %s2592_s3 }
   0x5   :  { %2638 = sst [smem:[#allocation31_spill]] %s2599_s10 }
   0x6   :  { %2639 = sst [smem:[#allocation32_spill]] %s2600_s11 }
   0x7   :  { %2640 = sst [smem:[#allocation33_spill]] %s2601_s12 }
   0x8   :  { %2641 = sst [smem:[#allocation34_spill]] %s2602_s13 }
   0x9   :  { %2642 = sst [smem:[#allocation35_spill]] %s2603_s14 }
   0xa   :  { %2643 = sst [smem:[#allocation36_spill]] %s2604_s15 }
   0xb   :  { %2644 = sst [smem:[#allocation37_spill]] %s2605_s16 }
   0xc   :  { %2645 = sst [smem:[#allocation38_spill]] %s2606_s17 }
   0xd   :  { %2646 = sst [smem:[#allocation39_spill]] %s2607_s18 }
   0xe   :  { %24 = vsyncpa [#allocation4], 0 }
   0xf   :  { %26 = vsyncpa [#allocation4 + $0x1], 0 }
  0x10   :  { %27 = vsyncpa [#allocation6], 0 }
  0x11   :  { %29 = vsyncpa [#allocation6 + $0x1], 0  ;;  %s2208_s27 = smov 0   ;;  %s2210_s28 = smov 0  }
  0x12   :  { %s2212_s29 = smov 0   ;;  %s2214_s30 = smov 0  }
  0x13   :  { %s2216_s0 = smov 0   ;;  %s2218_s19 = smov 0  }
  0x14   :  { %s2220_s1 = smov 0   ;;  %s2222_s20 = smov 0  }
  0x15   :  { %s2224_s21 = smov 0   ;;  %s2226_s22 = smov 0  }
  0x16   :  { %s2228_s2 = smov 0  }
  0x17 LB: > { %2647 = sst [smem:[#allocation9_spill]] %s2064_s27  ;;  %s1666_s23 = sadd.s32 4294967295, %s2104_s2   ;;  %s2104_s2 = sphi %s2228_s2, %s35_s2   ;;  %s2100_s22 = sphi %s2226_s22, %s2715_s22   ;;  %s2096_s21 = sphi %s2224_s21, %s2714_s21   ;;  %s2092_s20 = sphi %s2222_s20, %s2713_s20   ;;  %s2088_s1 = sphi %s2220_s1, %s2712_s1   ;;  %s2084_s19 = sphi %s2218_s19, %s2711_s19   ;;  %s2080_s0 = sphi %s2216_s0, %s2710_s0   ;;  %s2076_s30 = sphi %s2214_s30, %s2709_s30   ;;  %s2072_s29 = sphi %s2212_s29, %s2708_s29   ;;  %s2068_s28 = sphi %s2210_s28, %s2707_s28   ;;  %s2064_s27 = sphi %s2208_s27, %s2706_s27  }
  0x18   : > { %2648 = sst [smem:[#allocation10_spill]] %s2068_s28  ;;  %s1667_s24 = sadd.s32 4294967294, %s2104_s2  }
  0x19   : > { %2649 = sst [smem:[#allocation11_spill]] %s2072_s29  ;;  %s47_s25 = sadd.s32 1, %s2096_s21 }
  0x1a   : > { %2650 = sst [smem:[#allocation12_spill]] %s2076_s30  ;;  %s54_s26 = sadd.s32 1, %s2100_s22 }
  0x1b   : > { %2651 = sst [smem:[#allocation13_spill]] %s2080_s0  ;;  %p48_p0 = scmp.ge.s32.totalorder %s47_s25, 4 }
  0x1c   : > { %2652 = sst [smem:[#allocation14_spill]] %s2084_s19  ;;  %s474_s18 = sadd.s32 1, %s2084_s19 }
  0x1d   : > { %2653 = sst [smem:[#allocation15_spill]] %s2092_s20  ;;  %p484_p1 = scmp.ne.s32.totalorder %s2084_s19, %s2080_s0 }
  0x1e   : > { %2654 = sst [smem:[#allocation16_spill]] %s2096_s21  ;;  %p2270_p2 = scmp.eq.s32.totalorder %s1666_s23, 7 }
  0x1f   : > { %2655 = sst [smem:[#allocation17_spill]] %s2100_s22  ;;  %s2717_s25 = smov (%p48_p0, %s47_s25), 0 }
  0x20   : > { %2656 = sst [smem:[#allocation18_spill]] %s2104_s2  ;;  %s2719_s26 = smov (!%p48_p0, %s54_s26), %s2100_s22 }
  0x21   : > { %2658 = sst [smem:[#allocation19_spill]] %s2717_s25  ;;  %p2279_p3 = por %p2270_p2, %p484_p1 }
  0x22   : > { %p490_p4 = scmp.ne.s32.totalorder %s2080_s0, %s2076_s30  ;;  %p56_p5 = scmp.ge.s32.totalorder %s2719_s26, 2 }
  0x23   : > { %s2659_s14 = scalar_select %p2279_p3, 1, 0 }
  0x24   : > { %p2285_p6 = scmp.eq.s32.totalorder %s1667_s24, 7  ;;  %s498_s12 = ssub.s32 %s2096_s21, %s2717_s25 }
  0x25   : > { %2660 = sst [smem:[#allocation20_spill]] %s2659_s14  ;;  %s504_s13 = sadd.s32 1, %s2072_s29 }
  0x26   : > { %s2721_s26 = smov (%p56_p5, %s2719_s26), 0  ;;  %p2296_p7 = por %p2285_p6, %p490_p4 }
  0x27   : > { %2662 = sst [smem:[#allocation21_spill]] %s2721_s26  ;;  %p514_p8 = scmp.ne.s32.totalorder %s2072_s29, %s2068_s28 }
  0x28   : > { %s2663_s16 = scalar_select %p2296_p7, 1, 0 }
  0x29   : > { %s469_s30 = ssub.s32 %s2100_s22, %s2721_s26  ;;  %p520_p9 = scmp.ne.s32.totalorder %s2068_s28, %s2064_s27 }
  0x2a   : > { %2664 = sst [smem:[#allocation22_spill]] %s2663_s16  ;;  %p472_p10 = scmp.eq.s32.totalorder %s469_s30, 0 }
  0x2b   : > { %s499_s24 = sor.u32 %s498_s12, %s469_s30  ;;  %p2308_p12 = por %p514_p8, %p2270_p2 }
  0x2c   : > { %p502_p11 = scmp.eq.s32.totalorder %s499_s24, 0  ;;  %p2320_p13 = por %p520_p9, %p2285_p6 }
  0x2d   : > { %s2665_s14 = scalar_select %p2308_p12, 1, 0 }
  0x2e   : > { %s2313_s25 = scalar_select %p472_p10, %s2084_s19, %s474_s18  }
  0x2f   : > { %2666 = sst [smem:[#allocation23_spill]] %s2665_s14  ;;  %p1670_p0 = scmp.ge.s32.totalorder %s2104_s2, 1 }
  0x30   : > { %2667 = sst [smem:[#allocation24_spill]] %s2313_s25  ;;  %p636_p1 = scmp.lt.s32.totalorder %s2104_s2, 9 }
  0x31   : > { %s2316_s21 = scalar_select %p502_p11, %s2072_s29, %s504_s13  }
  0x32   : > { %s2669_s15 = scalar_select %p2320_p13, 1, 0 }
  0x33   : > { %2668 = sst [smem:[#allocation25_spill]] %s2316_s21  ;;  %p637_p4 = pnand %p1670_p0, %p636_p1 }
  0x34   : > { %2670 = sst [smem:[#allocation26_spill]] %s2669_s15  ;;  %s2616_s12 = sand.u32 (!%p637_p4), 1, %s2080_s0  }
  0x35   : > { %640 = sbr.rel (%p637_p4) target bundleno = 2326 (0x916), region = 88  ;;  %s2619_s13 = sand.u32 (!%p637_p4), 1, %s2068_s28  }
  0x36   : > { %s2330_s17 = sshll.u32 (!%p637_p4), %s2616_s12, 3  ;;  %s2334_s18 = sshll.u32 (!%p637_p4), %s2619_s13, 3 }
  0x37   : > { %p736_p2 = scmp.lt.s32.totalorder (!%p637_p4), %s2092_s20, 1  ;;  %p754_p5 = scmp.lt.s32.totalorder (!%p637_p4), %s2088_s1, 3 }
  0x38   : > { %s2672_s21 = sld [smem:[#allocation28_spill]] (!%p637_p4)  ;;  %s728_s10 = scalar_lea.vmem (!%p637_p4), [#allocation3], %s2330_s17 }
  0x39   : > { %s2674_s3 = sld [smem:[#allocation30_spill]] (!%p637_p4)  ;;  %s735_s12 = scalar_lea.vmem (!%p637_p4), [#allocation5], %s2334_s18 }
  0x3a   : > { %s737_s30 = scalar_select %p736_p2, %s2092_s20, 1 }
  0x3b   : > { %s2340_s23 = scalar_select %p754_p5, %s2088_s1, 3 }
  0x3c   : > { %s2342_s24 = sshll.u32 %s737_s30, 3  ;;  %p1683_p6 = scmp.ne.s32.totalorder %s2088_s1, 0 }
  0x3d   : > { %s1723_s14 = sshll.u32 %s2340_s23, 4  ;;  %s777_s0 = scalar_lea.vmem %s2597_s8, %s2340_s23 }
  0x3e   : > { %s746_s29 = scalar_lea.vmem %s2672_s21, %s2342_s24  ;;  %s766_s22 = scalar_lea.vmem %s2594_s5, %s1723_s14 }
  0x3f   : > { %s758_s30 = scalar_lea.vmem %s2674_s3, %s1723_s14  ;;  %s769_s21 = scalar_lea.vmem %s2595_s6, %s2340_s23 }
  0x40   : > { %s2374_s16 = scalar_lea.vmem %s2596_s7, %s1723_s14  ;;  %s1682_s2 = sshll.u32 %s2340_s23, 2 }
  0x41   : > { %s2384_s26 = scalar_lea.vmem %s2598_s9, %s1682_s2  ;;  %786 = sbr.rel (%p1683_p6) target bundleno = 72 (0x48), region = 92 }
  0x46   : > { %vm787_vm0 = vcmask 261120   ;;  %v2106_v0 = vmov 0.0  }
  0x47   : > { %788 = vst.msk [vmem:[#allocation2] sm:$0xff] %vm787_vm0, %v2106_v0 }
  0x48 PF: > { %v1928_v1 = vld [vmem:[%s766_s22 + $0x8] sm:$0xff]   ;;  %v2107_v2 = vmov 0.0   ;;  %v1930_v4 = vld [vmem:[%s766_s22] sm:$0xff]   ;;  %vm2108_vm1 = vmmov 0   ;;  %s2676_s15 = sld [smem:[#allocation27_spill]]  ;;  %vm816_vm2 = vcmask 261120   ;;  %s2678_s11 = scalar_lea.vmem %s2593_s4, %s2340_s23 }
  0x49   : > { %1761 = vmatprep.subr.bf16.mxu1 %v2107_v2  ;;  %1753 = vmatprep.subr.bf16.mxu0 %v2107_v2  ;;  %v1929_v3 = vld [vmem:[%s758_s30 + $0x8] sm:$0xff]   ;;  %v1931_v5 = vld [vmem:[%s758_s30] sm:$0xff]   ;;  %vm991_vm3 = vcmask 64512   ;;  %s2679_s14 = sld [smem:[#allocation29_spill]]  ;;  %vm1058_vm4 = vcmask 1043456   ;;  %p1699_p8 = scmp.ne.s32.totalorder %s2088_s1, 3 }
  0x4a   : > { %1762 = vmatpush3.bf16.msra.mxu1 %v1928_v1  ;;  %1765 = vmatprep.mubr.msk.bf16.mxu1 %vm2108_vm1, %v2107_v2  ;;  %v791_v6 = vld [vmem:[%s746_s29] sm:$0xff]  ;;  %v1932_v25 = vld [vmem:[%s2374_s16 + $0x8] sm:$0xff]   ;;  %s2682_s25 = sld [smem:[#allocation32_spill]] (!%p1699_p8) }
  0x4b   : > { %1754 = vmatpush3.bf16.msra.mxu0 %v1929_v3  ;;  %1763 = vmatprep.subr.bf16.mxu1 %v2107_v2  ;;  %v792_v8 = vpack.c.bf16 %v791_v6, %v791_v6  ;;  %v1688_v10 = vld [vmem:[%s769_s21] ss:$0 sm:$0xff]  ;;  %s2683_s22 = sld [smem:[#allocation36_spill]] (!%p1699_p8) }
  0x4c   : > { %1755 = vmatprep.subr.bf16.mxu0 %v2107_v2  ;;  %1757 = vmatprep.mubr.msk.bf16.mxu0 %vm2108_vm1, %v2107_v2  ;;  %v1684_v15 = vld [vmem:[%s2678_s11] ss:$0 sm:$0xff]  ;;  %s2684_s21 = sld [smem:[#allocation37_spill]] (!%p1699_p8) }
  0x4d   : > { %v1933_v26 = vld [vmem:[%s2374_s16] sm:$0xff]  }
  0x4e   : > { %s2677_s27 = scalar_lea.vmem %s2676_s15, %s2342_s24  ;;  %1764 = vmatpush3.bf16.msra.mxu1 %v1930_v4  ;;  %v1692_v43 = vld [vmem:[%s777_s0] ss:$0 sm:$0xff]  ;;  %s2681_s0 = sld [smem:[#allocation31_spill]] (!%p1699_p8) }
  0x4f   : > { %v2401_v7 = vld [vmem:[%s2677_s27] sm:$0xff]  ;;  %1756 = vmatpush3.bf16.msra.mxu0 %v1931_v5  ;;  %1777 = vmatprep.subr.bf16.mxu1 %v2107_v2  ;;  %s2680_s2 = scalar_lea.vmem %s2679_s14, %s2342_s24 }
  0x50   : > { %v790_v9 = vpack.c.bf16 %v2401_v7, %v2401_v7  ;;  %1769 = vmatprep.subr.bf16.mxu0 %v2107_v2  ;;  %v1039_v28 = vld [vmem:[%s2680_s2] sm:$0xff]  ;;  %s2685_s2 = sld [smem:[#allocation34_spill]] (!%p1699_p8) }
  0x51   : > { %1766 = vmatmul.mubr.msk.bf16.vlgmr.msra.gmra.mxu1 %vm816_vm2, %v792_v8  ;;  %v1104_v48 = vld [vmem:[%s2384_s26] sm:$0xf]  ;;  %s2688_s26 = sld [smem:[#allocation35_spill]] (!%p1699_p8) }
  0x52   : > { %1758 = vmatmul.mubr.msk.bf16.vlgmr.msra.gmra.mxu0 %vm816_vm2, %v790_v9  ;;  %1779 = vmatprep.mubr.msk.bf16.mxu1 %vm2108_vm1, %v2107_v2  ;;  %v1109_v49 = vsel %vm1058_vm4, %v1104_v48, 0  ;;  %v1102_v59 = vld [vmem:[#allocation2] sm:$0xff] }
  0x53   : > { %1773 = vmatprep.mubr.msk.bf16.mxu0 %vm2108_vm1, %v2107_v2  ;;  %1770 = vmatpush3.bf16.msra.mxu0 %v1932_v25 }
  0x54   : > { %1771 = vmatprep.subr.bf16.mxu0 %v2107_v2 }
  0x56   : > { %s2686_s24 = smov (!%p1699_p8), %s2685_s2 }
  0x57   : > { %1772 = vmatpush3.bf16.msra.mxu0 %v1933_v26 }
  0x58   : > { %1783 = vmatprep.subr.bf16.mxu0 %v2107_v2 }
  0x5a   : > { %1774 = vmatmul.mubr.msk.bf16.vlgmr.msra.gmra.mxu0 %vm816_vm2, %v792_v8 }
  0x5b   : > { %1785 = vmatprep.mubr.msk.bf16.mxu0 %vm2108_vm1, %v2107_v2 }
 0x111   : > { %v920_v11 = vpop.f32.mrf.mxu1 }
 0x112   : > { %v921_v12 = vadd.f32 %v1688_v10, %v920_v11  ;;  %v854_v13 = vpop.f32.mrf.mxu0 }
 0x113   : > { %v1767_v14 = vpop.f32.mrf.mxu1  ;;  %v855_v20 = vadd.f32 %v1684_v15, %v854_v13 }
 0x114   : > { %v990_v16 = vpack.c.bf16 %v921_v12, %v921_v12  ;;  %v1759_v17 = vpop.f32.mrf.mxu0 }
 0x115   : > { %v923_v18 = vpop.f32.mrf.mxu1  ;;  %v989_v24 = vpack.c.bf16 %v855_v20, %v855_v20 }
 0x116   : > { %v996_v19 = vsel %vm991_vm3, %v990_v16, 0  ;;  %v857_v21 = vpop.f32.mrf.mxu0 }
 0x117   : > { %v1768_v22 = vpop.f32.mrf.mxu1  ;;  %1778 = vmatpush3.bf16.xpose.msra.mxu1 %v996_v19 }
 0x118   : > { %v1760_v23 = vpop.f32.mrf.mxu0  ;;  %1789 = vmatprep.subr.bf16.mxu1 %v2107_v2 }
 0x11a   : > { %v983_v40 = vpop.f32.mrf.mxu0 }
 0x11b   : > { %v984_v45 = vadd.f32 %v1692_v43, %v983_v40 }
 0x11c   : > { %v1775_v41 = vpop.f32.mrf.mxu0 }
 0x11d   : > { %v1054_v46 = vpack.c.bf16 %v984_v45, %v984_v45 }
 0x11e   : > { %1780 = vmatmul.mubr.msk.bf16.vlgmr.msra.gmra.mxu1 %vm991_vm3, %v989_v24  ;;  %v986_v42 = vpop.f32.mrf.mxu0 }
 0x11f   : > { %1791 = vmatprep.mubr.msk.bf16.mxu1 %vm2108_vm1, %v2107_v2  ;;  %v1060_v47 = vsel %vm1058_vm4, %v1054_v46, 0  ;;  %1790 = vmatpush3.bf16.msra.mxu1 %v1109_v49 }
 0x120   : > { %v1776_v44 = vpop.f32.mrf.mxu0  ;;  %1784 = vmatpush3.bf16.msra.mxu0 %v1060_v47 }
 0x1de   : > { %v1032_v27 = vpop.f32.mrf.mxu1 }
 0x1df   : > { %v1038_v29 = vmul.f32 0.35355338, %v1032_v27 }
 0x1e0   : > { %v1781_v30 = vpop.f32.mrf.mxu1 }
 0x1e1   : > { %v1040_v31 = vadd.f32 %v1039_v28, %v1038_v29 }
 0x1e2   : > { %v1035_v32 = vpop.f32.mrf.mxu1 }
 0x1e3   : > { %v1041_v33 = vsel %vm991_vm3, %v1040_v31, -inf }
 0x1e4   : > { %1042 = vmax.xlane.f32.xlu0 %v1041_v33  ;;  %v1782_v34 = vpop.f32.mrf.mxu1 }
 0x26d   : > { %v1043_v35 = vpop.xlane.xlu0 %1042 }
 0x26e   : > { %v1044_v36 = vsub.f32 %v1040_v31, %v1043_v35 }
 0x270   : > { %v1045_v37 = vmul.f32 1.442695, %v1044_v36 }
 0x272   : > { %1934 = vpow2.f32 %v1045_v37 }
 0x27f   : > { %v1935_v38 = vpop.eup %1934 }
 0x280   : > { %v1047_v39 = vsel %vm991_vm3, %v1935_v38, 0.0 }
 0x281   : > { %1048 = vadd.xlane.f32.xlu0 %v1047_v39 }
 0x30a   : > { %v1049_v50 = vpop.xlane.xlu0 %1048 }
 0x30b   : > { %1936 = vrcp.f32 %v1049_v50 }
 0x318   : > { %v1937_v51 = vpop.eup %1936 }
 0x319   : > { %v1051_v52 = vmul.f32 %v1937_v51, %v1935_v38 }
 0x31b   : > { %1052 = vst.msk [vmem:[%s735_s12] sm:$0xff] %vm991_vm3, %v1051_v52  ;;  %v1053_v53 = vpack.c.bf16 %v1051_v52, %v1051_v52 }
 0x31d   : > { %1786 = vmatmul.mubr.msk.bf16.vlgmr.msra.gmra.mxu0 %vm991_vm3, %v1053_v53 }
 0x3dd   : > { %v1096_v54 = vpop.f32.mrf.mxu0 }
 0x3de   : > { %v1103_v55 = vpack.c.bf16 %v1096_v54, %v1096_v54 }
 0x3df   : > { %v1787_v56 = vpop.f32.mrf.mxu0 }
 0x3e0   : > { %1792 = vmatmul.mubr.msk.bf16.vlgmr.msra.gmra.mxu1 %vm991_vm3, %v1103_v55 }
 0x3e1   : > { %v1099_v57 = vpop.f32.mrf.mxu0 }
 0x3e3   : > { %v1788_v58 = vpop.f32.mrf.mxu0 }
 0x4a0   : > { %v1145_v60 = vpop.f32.mrf.mxu1 }
 0x4a1   : > { %v1151_v61 = vadd.f32 %v1145_v60, %v1102_v59 }
 0x4a2   : > { %v1793_v62 = vpop.f32.mrf.mxu1  ;;  %1156 = sbr.rel (%p1699_p8) target bundleno = 2276 (0x8e4), region = 96 }
 0x4a3   : > { %1152 = vst.msk [vmem:[#allocation2] sm:$0xff] %vm816_vm2, %v1151_v61 }
 0x4a4   : > { %v1148_v63 = vpop.f32.mrf.mxu1 }
 0x4a6   : > { %v1794_v0 = vpop.f32.mrf.mxu1 }
 0x4a7   : > { %v1700_v2 = vld [vmem:[%s2681_s0] ss:$0 sm:$0xff]  ;;  %v1938_v11 = vld [vmem:[%s2682_s25 + $0x8] sm:$0xff]   ;;  %v2109_v12 = vmov 0.0   ;;  %vm2110_vm5 = vmmov 0   ;;  %v1940_v30 = vld [vmem:[%s2685_s2 + $0x38] sm:$0xff]  }
 0x4a8   : > { %1795 = vmatprep.subr.bf16.mxu0 %v2109_v12  ;;  %1799 = vmatprep.mubr.msk.bf16.mxu0 %vm2110_vm5, %v2109_v12  ;;  %v1939_v13 = vld [vmem:[%s2682_s25] sm:$0xff]   ;;  %v1941_v31 = vld [vmem:[%s2686_s24 + $0x30] sm:$0xff]   ;;  %v1942_v32 = vld [vmem:[%s2686_s24 + $0x28] sm:$0xff]   ;;  %s2687_s2 = sld [smem:[#allocation33_spill]] }
 0x4a9   : > { %1796 = vmatpush3.bf16.msra.mxu0 %v1938_v11  ;;  %1803 = vmatprep.subr.bf16.mxu1 %v2109_v12  ;;  %v2460_v23 = vld [vmem:[%s2683_s22] ss:$0 sm:$0xff]  ;;  %v1944_v33 = vld [vmem:[%s2686_s24 + $0x18] sm:$0xff]   ;;  %v1945_v34 = vld [vmem:[%s2686_s24 + $0x10] sm:$0xff]  }
 0x4aa   : > { %v1159_v1 = vld [vmem:[#allocation2] sm:$0xff]  ;;  %1797 = vmatprep.subr.bf16.mxu0 %v2109_v12  ;;  %1819 = vmatprep.mubr.msk.bf16.mxu1 %vm2110_vm5, %v2109_v12  ;;  %v1946_v35 = vld [vmem:[%s2686_s24 + $0x8] sm:$0xff]  }
 0x4ab   : > { %v1167_v3 = vadd.f32 %v1700_v2, %v1159_v1  ;;  %v2465_v25 = vld [vmem:[%s2684_s21] ss:$0 sm:$0xff]  ;;  %1804 = vmatpush3.bf16.msra.mxu1 %v1940_v30 }
 0x4ac   : > { %1805 = vmatprep.subr.bf16.mxu1 %v2109_v12  ;;  %v1947_v36 = vld [vmem:[%s2686_s24] sm:$0xff]  }
 0x4ad   : > { %v1168_v4 = vsel %vm816_vm2, %v1167_v3, 0.0  ;;  %1798 = vmatpush3.bf16.msra.mxu0 %v1939_v13  ;;  %v1707_v53 = vld [vmem:[%s2688_s26] ss:$0 sm:$0xff] }
 0x4ae   : > { %1169 = vadd.xlane.f32.xlu0 %v1168_v4  ;;  %v1703_v37 = vld [vmem:[%s2687_s2] ss:$0 sm:$0xff] }
 0x4af   : > { %1806 = vmatpush3.bf16.msra.mxu1 %v1941_v31 }
 0x4b0   : > { %1807 = vmatprep.subr.bf16.mxu1 %v2109_v12 }
 0x4b3   : > { %1808 = vmatpush3.bf16.msra.mxu1 %v1942_v32 }
 0x4b4   : > { %1809 = vmatprep.subr.bf16.mxu1 %v2109_v12 }
 0x537   : > { %v1170_v5 = vpop.xlane.xlu0 %1169 }
 0x538   : > { %v1172_v6 = vmul.f32 0.03125, %v1170_v5 }
 0x53a   : > { %v1173_v8 = vsub.f32 %v1167_v3, %v1172_v6 }
 0x53c   : > { %v1174_v9 = vmul.f32 %v1173_v8, %v1173_v8 }
 0x53e   : > { %v1175_v10 = vsel %vm816_vm2, %v1174_v9, 0.0 }
 0x53f   : > { %1176 = vadd.xlane.f32.xlu0 %v1175_v10 }
 0x5c8   : > { %v1177_v14 = vpop.xlane.xlu0 %1176 }
 0x5c9   : > { %v1178_v15 = vmul.f32 0.032258064, %v1177_v14 }
 0x5cb   : > { %1948 = vrsqrt.f32 %v1178_v15  ;;  %vm1181_vm6 = vcmp.eq.f32.partialorder %v1178_v15, inf  ;;  %v1184_v18 = vand.u32 2147483648, %v1178_v15  ;;  %vm1183_vm7 = vcmp.eq.f32.partialorder %v1178_v15, 0.0 }
 0x5d8   : > { %v1949_v16 = vpop.eup %1948 }
 0x5d9   : > { %v1180_v17 = vmul.f32 %v1949_v16, %v1178_v15 }
 0x5db   : > { %v1182_v19 = vsel %vm1181_vm6, %v1178_v15, %v1180_v17 }
 0x5dc   : > { %v1185_v20 = vsel %vm1183_vm7, %v1184_v18, %v1182_v19 }
 0x5dd   : > { %v1186_v21 = vadd.f32 1e-06, %v1185_v20 }
 0x5df   : > { %1950 = vrcp.f32 %v1186_v21 }
 0x5ec   : > { %v1951_v22 = vpop.eup %1950 }
 0x5ed   : > { %v1188_v24 = vmul.f32 %v1951_v22, %v1173_v8 }
 0x5ef   : > { %v1195_v26 = vmul.f32 %v2460_v23, %v1188_v24 }
 0x5f1   : > { %v1202_v27 = vadd.f32 %v2465_v25, %v1195_v26 }
 0x5f3   : > { %v1203_v28 = vadd.f32 %v1202_v27, %v2401_v7  ;;  %v1943_v7 = vld [vmem:[%s2686_s24 + $0x20] sm:$0xff]  }
 0x5f4   : > { %1810 = vmatpush3.bf16.msra.mxu1 %v1943_v7 }
 0x5f5   : > { %v1204_v29 = vpack.c.bf16 %v1203_v28, %v1203_v28  ;;  %1811 = vmatprep.subr.bf16.mxu1 %v2109_v12 }
 0x5f7   : > { %1800 = vmatmul.mubr.msk.bf16.vlgmr.msra.gmra.mxu0 %vm816_vm2, %v1204_v29 }
 0x5f8   : > { %1812 = vmatpush3.bf16.msra.mxu1 %v1944_v33 }
 0x5f9   : > { %1813 = vmatprep.subr.bf16.mxu1 %v2109_v12 }
 0x5fc   : > { %1814 = vmatpush3.bf16.msra.mxu1 %v1945_v34 }
 0x5fd   : > { %1815 = vmatprep.subr.bf16.mxu1 %v2109_v12 }
 0x600   : > { %1816 = vmatpush3.bf16.msra.mxu1 %v1946_v35 }
 0x601   : > { %1817 = vmatprep.subr.bf16.mxu1 %v2109_v12 }
 0x604   : > { %1818 = vmatpush3.bf16.msra.mxu1 %v1947_v36 }
 0x6b7   : > { %v1265_v38 = vpop.f32.mrf.mxu0 }
 0x6b8   : > { %v1266_v39 = vadd.f32 %v1703_v37, %v1265_v38 }
 0x6b9   : > { %v1801_v40 = vpop.f32.mrf.mxu0 }
 0x6ba   : > { %v1272_v41 = vmul.f32 0.044715, %v1266_v39  ;;  %v1271_v49 = vmul.f32 0.5, %v1266_v39 }
 0x6bb   : > { %v1268_v42 = vpop.f32.mrf.mxu0 }
 0x6bc   : > { %v1273_v43 = vmul.f32 %v1272_v41, %v1266_v39 }
 0x6bd   : > { %v1802_v44 = vpop.f32.mrf.mxu0 }
 0x6be   : > { %v1274_v45 = vmul.f32 %v1273_v43, %v1266_v39 }
 0x6c0   : > { %v1275_v46 = vadd.f32 %v1274_v45, %v1266_v39 }
 0x6c2   : > { %v1276_v47 = vmul.f32 0.7978846, %v1275_v46 }
 0x6c4   : > { %1952 = vtanh.f32 %v1276_v47 }
 0x6d1   : > { %v1953_v48 = vpop.eup %1952 }
 0x6d2   : > { %v1278_v50 = vadd.f32 1.0, %v1953_v48 }
 0x6d4   : > { %v1279_v51 = vmul.f32 %v1278_v50, %v1271_v49 }
 0x6d6   : > { %v1280_v52 = vpack.c.bf16 %v1279_v51, %v1279_v51 }
 0x6d8   : > { %1820 = vmatmul.mubr.bf16.vlgmr.msra.gmra.mxu1 %v1280_v52 }
 0x798   : > { %v1386_v54 = vpop.f32.mrf.mxu1 }
 0x799   : > { %v1387_v55 = vadd.f32 %v1707_v53, %v1386_v54 }
 0x79a   : > { %v1821_v56 = vpop.f32.mrf.mxu1 }
 0x79b   : > { %v1392_v57 = vadd.f32 %v1387_v55, %v1203_v28 }
 0x79c   : > { %v1389_v58 = vpop.f32.mrf.mxu1 }
 0x79d   : > { %v1393_v59 = vsel %vm816_vm2, %v1392_v57, 0.0 }
 0x79e   : > { %1394 = vadd.xlane.f32.xlu1 %v1393_v59  ;;  %v1822_v60 = vpop.f32.mrf.mxu1 }
 0x827   : > { %v1395_v61 = vpop.xlane.xlu1 %1394 }
 0x828   : > { %v1396_v62 = vmul.f32 0.03125, %v1395_v61 }
 0x82a   : > { %v1397_v63 = vsub.f32 %v1392_v57, %v1396_v62 }
 0x82c   : > { %v1398_v0 = vmul.f32 %v1397_v63, %v1397_v63 }
 0x82e   : > { %v1399_v1 = vsel %vm816_vm2, %v1398_v0, 0.0 }
 0x82f   : > { %1400 = vadd.xlane.f32.xlu1 %v1399_v1 }
 0x8b8   : > { %v1401_v2 = vpop.xlane.xlu1 %1400 }
 0x8b9   : > { %v1402_v3 = vmul.f32 0.032258064, %v1401_v2 }
 0x8bb   : > { %1954 = vrsqrt.f32 %v1402_v3  ;;  %vm1405_vm8 = vcmp.eq.f32.partialorder %v1402_v3, inf  ;;  %v1408_v6 = vand.u32 2147483648, %v1402_v3  ;;  %vm1407_vm9 = vcmp.eq.f32.partialorder %v1402_v3, 0.0 }
 0x8c8   : > { %v1955_v4 = vpop.eup %1954 }
 0x8c9   : > { %v1404_v5 = vmul.f32 %v1955_v4, %v1402_v3 }
 0x8cb   : > { %v1406_v8 = vsel %vm1405_vm8, %v1402_v3, %v1404_v5 }
 0x8cc   : > { %v1409_v9 = vsel %vm1407_vm9, %v1408_v6, %v1406_v8 }
 0x8cd   : > { %v1410_v10 = vadd.f32 1e-06, %v1409_v9 }
 0x8cf   : > { %1956 = vrcp.f32 %v1410_v10 }
 0x8dc   : > { %v1957_v11 = vpop.eup %1956 }
 0x8dd   : > { %v1412_v12 = vmul.f32 %v1957_v11, %v1397_v63 }
 0x8df   : > { %v1413_v13 = vmul.f32 %v2460_v23, %v1412_v12 }
 0x8e1   : > { %v1414_v14 = vadd.f32 %v2465_v25, %v1413_v13 }
 0x8e3   : > { %1415 = vst.msk [vmem:[%s728_s10] sm:$0xff] %vm816_vm2, %v1414_v14 }
 0x8e4 PF: > { %s2689_s0 = sld [smem:[#allocation15_spill]]  ;;  %s1436_s28 = sshll.u32 %s728_s10, 4  ;;  %s1437_s28 = int_to_ptr.vmem [resolvable:$true] %s1436_s28 }
 0x8e5   : > { %s2690_s13 = sld [smem:[#allocation13_spill]]  ;;  %s1958_s14 = scalar_lea.vmem %s1437_s28, 128 }
 0x8e6   : > { %s2692_s30 = sld [smem:[#allocation38_spill]]  ;;  %p1959_p9 = scmp.ne.s32.totalorder %s1437_s28, %s1958_s14 }
 0x8e7   : > { %s2111_s2 = smov [#allocation3]  }
 0x8e8   : > { %p1960_p10 = pnand %p1959_p9, %p2279_p3  ;;  %s1962_s16 = sshll.u32 %s2111_s2, 4  ;;  %s1963_s16 = int_to_ptr.vmem [resolvable:$false] %s1962_s16 }
 0x8e9   : > { %s1964_s23 = scalar_lea.vmem %s1963_s16, 256  ;;  %p1965_p0 = scmp.lt.s32.totalorder %s1437_s28, %s1963_s16 }
 0x8ea   : > { %s1718_s15 = sshll.u32 %s2689_s0, 7  ;;  %p1961_p11 = pneg %p1960_p10 }
 0x8eb   : > { %s2694_s21 = sand.u32 1, %s2690_s13   ;;  %p1966_p1 = scmp.lt.s32.totalorder %s1964_s23, %s1958_s14 }
 0x8ec   : > { %s2693_s11 = smov %s2692_s30  ;;  %s1434_s22 = scalar_lea.hbm %s2692_s30, %s1718_s15 }
 0x8ed   : > { %s1417_s20 = scalar_lea.sflag [#allocation4], %s2694_s21  ;;  %p1967_p4 = por %p1966_p1, %p1965_p0 }
 0x8ef   : > { %p1968_p2 = pnand %p1967_p4, %p1961_p11 }
 0x8f1   : > { %1971 = shalt.err (!%p1968_p2)
}
 0x8f2   : > { %s1972_s26 = scalar_lea.hbm %s1434_s22, 128  ;;  %s1976_s13 = scalar_lea.hbm %s2693_s11, 256 }
 0x8f3   : > { %p1973_p5 = scmp.ne.s32.totalorder %s1434_s22, %s1972_s26  ;;  %p1977_p9 = scmp.lt.s32.totalorder %s1434_s22, %s2693_s11 }
 0x8f4   : > { %p1978_p10 = scmp.lt.s32.totalorder %s1976_s13, %s1972_s26 }
 0x8f5   : > { %p1974_p6 = pnand %p1973_p5, %p2279_p3 }
 0x8f6   : > { %p1979_p13 = por %p1978_p10, %p1977_p9 }
 0x8f7   : > { %p1975_p8 = pneg %p1974_p6 }
 0x8f9   : > { %p1980_p7 = pnand %p1979_p13, %p1975_p8 }
 0x8fb   : > { %1983 = shalt.err (!%p1980_p7)
}
 0x8fc   : > { %s2695_s29 = sld [smem:[#allocation10_spill]]  ;;  %s1719_s21 = sshll.u32 %s2689_s0, 2 }
 0x8fd   : > { %1823 = dma.vmem_to_hbm [thread:$0]  (%p2279_p3), %s1437_s28, 128, %s1434_s22, %s1417_s20  }
 0x8fe   : > { %s1452_s14 = sshll.u32 %s735_s12, 4  ;;  %s1448_s2 = sadd.s32 %s2088_s1, %s1719_s21  ;;  %s1453_s14 = int_to_ptr.vmem [resolvable:$true] %s1452_s14 }
 0x8ff   : > { %s1720_s16 = sshll.u32 %s1448_s2, 7  ;;  %s2697_s26 = sld [smem:[#allocation39_spill]] }
 0x900   : > { %s1984_s27 = scalar_lea.vmem %s1453_s14, 128  ;;  %s2112_s19 = smov [#allocation5]  }
 0x901   : > { %p1985_p7 = scmp.ne.s32.totalorder %s1453_s14, %s1984_s27  ;;  %s1988_s3 = sshll.u32 %s2112_s19, 4  ;;  %s1989_s3 = int_to_ptr.vmem [resolvable:$false] %s1988_s3 }
 0x902   : > { %s2698_s13 = sand.u32 1, %s2695_s29   ;;  %s1990_s0 = scalar_lea.vmem %s1989_s3, 256 }
 0x903   : > { %s1422_s15 = scalar_lea.sflag [#allocation6], %s2698_s13  ;;  %p1986_p13 = pnand %p1985_p7, %p2308_p12 }
 0x904   : > { %p1991_p3 = scmp.lt.s32.totalorder %s1453_s14, %s1989_s3  ;;  %p1992_p0 = scmp.lt.s32.totalorder %s1990_s0, %s1984_s27 }
 0x905   : > { %s1450_s10 = scalar_lea.hbm %s2697_s26, %s1720_s16  ;;  %p1987_p11 = pneg %p1986_p13 }
 0x906   : > { %p1993_p1 = por %p1992_p0, %p1991_p3 }
 0x908   : > { %p1994_p4 = pnand %p1993_p1, %p1987_p11 }
 0x90a   : > { %1997 = shalt.err (!%p1994_p4)
}
 0x90b   : > { %s1998_s1 = scalar_lea.hbm %s1450_s10, 128  ;;  %s2002_s22 = scalar_lea.hbm %s2697_s26, 1024 }
 0x90c   : > { %p1999_p2 = scmp.ne.s32.totalorder %s1450_s10, %s1998_s1  ;;  %p2003_p8 = scmp.lt.s32.totalorder %s1450_s10, %s2697_s26 }
 0x90d   : > { %p2004_p9 = scmp.lt.s32.totalorder %s2002_s22, %s1998_s1 }
 0x90e   : > { %p2000_p5 = pnand %p1999_p2, %p2308_p12 }
 0x90f   : > { %p2005_p10 = por %p2004_p9, %p2003_p8 }
 0x910   : > { %p2001_p6 = pneg %p2000_p5 }
 0x912   : > { %p2006_p7 = pnand %p2005_p10, %p2001_p6 }
 0x914   : > { %2009 = shalt.err (!%p2006_p7)
}
 0x915   : > { %1824 = dma.vmem_to_hbm [thread:$0]  (%p2308_p12), %s1453_s14, 128, %s1450_s10, %s1422_s15  }
 0x916 PF: > { %s2699_s3 = sld [smem:[#allocation18_spill]] }
 0x917   : > { %s2700_s29 = sld [smem:[#allocation12_spill]] }
 0x918   : > { %s2701_s21 = sld [smem:[#allocation22_spill]] }
 0x91c   : > { %p1834_p13 = scmp.ge.s32.totalorder %s2699_s3, 2 }
 0x91d   : > { %s1464_s2 = sand.u32 1, %s2700_s29  }
 0x91e   : > { %p2702_p11 = scmp.ne.s32.totalorder %s2701_s21, 0  ;;  %s1465_s16 = scalar_lea.sflag [#allocation4], %s1464_s2 }
 0x920   : > { %p1828_p3 = pnand %p1834_p13, %p2702_p11 }
 0x922   : > { %p1829_p0 = pneg %p1828_p3 }
 0x924   : > { %2055 = dma.done.wait (%p1829_p0), %s1465_s16, 128  }
 0x925   : > { %2057 = vsyncadd (%p1829_p0), %s1465_s16, 4294967168  ;;  %s2703_s23 = sld [smem:[#allocation9_spill]] }
 0x926   : > { %s2704_s17 = sld [smem:[#allocation26_spill]] }
 0x92b   : > { %s1473_s13 = sand.u32 1, %s2703_s23  }
 0x92c   : > { %p2705_p1 = scmp.ne.s32.totalorder %s2704_s17, 0  ;;  %s1474_s30 = scalar_lea.sflag [#allocation6], %s1473_s13 }
 0x92e   : > { %p1831_p4 = pnand %p1834_p13, %p2705_p1 }
 0x930   : > { %p1832_p2 = pneg %p1831_p4 }
 0x932   : > { %2059 = dma.done.wait (%p1832_p2), %s1474_s30, 128  }
 0x933   : > { %2061 = vsyncadd (%p1832_p2), %s1474_s30, 4294967168  ;;  %s35_s2 = sadd.s32 1, %s2699_s3   ;;  %s2706_s27 = sld [smem:[#allocation10_spill]] }
 0x934   : > { %p32_p12 = scmp.ge.s32.totalorder %s35_s2, 10   ;;  %s2707_s28 = sld [smem:[#allocation11_spill]] }
 0x935   : > { %s2708_s29 = sld [smem:[#allocation25_spill]] }
 0x936   : > { %s2709_s30 = sld [smem:[#allocation13_spill]] }
 0x937   : > { %s2710_s0 = sld [smem:[#allocation14_spill]] }
 0x938   : > { %s2711_s19 = sld [smem:[#allocation24_spill]]  ;;  %34 = sbr.rel (!%p32_p12) target bundleno = 23 (0x17), region = 175 }
 0x939   : > { %s2712_s1 = sld [smem:[#allocation16_spill]] }
 0x93a   : > { %s2713_s20 = sld [smem:[#allocation17_spill]] }
 0x93b   : > { %s2714_s21 = sld [smem:[#allocation19_spill]] }
 0x93c   : > { %s2715_s22 = sld [smem:[#allocation21_spill]] }
 0x93d   :  { %1479 = vsyncpa [#allocation4], 1 }
 0x93e   :  { %1481 = vsyncpa [#allocation4 + $0x1], 1 }
 0x93f   :  { %1482 = vsyncpa [#allocation6], 1 }
 0x940   :  { %1484 = vsyncpa [#allocation6 + $0x1], 1 }

</bundles_post_ra>
